<compile_context>
chip_gen: v5e
topology: v5e:2x2
jax: 0.10.0
libtpu: 0.0.40
codegen_flags: <defaults>
</compile_context>

<pallas_src>
import jax
import jax.numpy as jnp
from jax.experimental import pallas as pl
from jax.experimental.pallas import tpu as pltpu


_LANE = 128
_VMEM_BUDGET = 40 * 1024 * 1024   # stay well under v7x's 64 MiB physical VMEM


def _round_up(x, m):
    return (x + m - 1) // m * m


def _value_mlp_kernel(x_ref, w1_ref, b1_ref, w2_ref, b2_ref, w3_ref, b3_ref,
                      o_ref):
    """x_ref: (TB, S) f32 batch tile; w*: compute dtype; b1/b2: (1, H_pad) f32;
    w3_ref: (1, H_pad) row; b3_ref: (1, 1) f32 scalar in SMEM;
    o_ref: (1, TB) f32 — batch on lanes (lane-dense store)."""
    cd = w1_ref.dtype
    x = x_ref[...].astype(cd)                       # VPU cast, hidden under MXU/DMA
    h = jnp.dot(x, w1_ref[...], preferred_element_type=jnp.float32)
    h = jnp.maximum(h + b1_ref[...], 0.0)           # bias + ReLU in f32
    h = jnp.dot(h.astype(cd), w2_ref[...], preferred_element_type=jnp.float32)
    h = jnp.maximum(h + b2_ref[...], 0.0)
    # Final projection with the batch dim landing on lanes:
    # (1, H_pad) x (TB, H_pad), contracting H on both sides -> (1, TB).
    out = jax.lax.dot_general(
        w3_ref[...], h.astype(cd),
        dimension_numbers=(((1,), (1,)), ((), ())),
        preferred_element_type=jnp.float32)
    o_ref[...] = out + b3_ref[0, 0]                 # unmasked lane-dense store


def _vmem_estimate(tb, s, h_pad, itemsize):
    # double-buffered streamed x/out blocks + double-buffered resident weights
    # + in-flight f32 activations (rough upper bound).
    weights = (s * h_pad + h_pad * h_pad + h_pad) * itemsize + (2 * h_pad + 1) * 4
    streamed = tb * s * 4 + tb * 4
    interm = 3 * tb * h_pad * 4
    return 2 * (weights + streamed) + interm


def _pick_tiling(b, s, h_pad, block_b, itemsize):
    """Batch tile TB (multiple of 128) and grid length."""
    tb = min(_round_up(max(b, 1), _LANE), _round_up(max(block_b, _LANE), _LANE))
    while tb > _LANE and _vmem_estimate(tb, s, h_pad, itemsize) > _VMEM_BUDGET:
        tb -= _LANE
    n = -(-b // tb)
    if n > 1 and n % 2:
        n += 1                                      # even grid: both v7x TCs busy
    tb = _round_up(-(-b // n), _LANE)               # minimize B_pad rounding waste
    return tb, n


def pack_value_network_params(params, compute_dtype=jnp.bfloat16):
    """One-time padding/casting of raw (in, out)-layout f32 params into the
    kernel layout.  Zero padding is inert through the matmuls and ReLUs."""
    s, h = params["w1"].shape
    # 256-lane alignment feeds the v6e/v7x 256x256 MXU on the dominant HxH
    # matmul once it is compute-bound; below that 128 keeps padding waste low.
    h_pad = _round_up(h, 256) if h >= 512 else _round_up(h, _LANE)
    ph = h_pad - h
    return {
        "w1": jnp.pad(params["w1"], ((0, 0), (0, ph))).astype(compute_dtype),
        "b1": jnp.pad(params["b1"], ((0, 0), (0, ph))).astype(jnp.float32),
        "w2": jnp.pad(params["w2"], ((0, ph), (0, ph))).astype(compute_dtype),
        "b2": jnp.pad(params["b2"], ((0, 0), (0, ph))).astype(jnp.float32),
        # Final projection stored as a (1, H_pad) row so the kernel's NT
        # matmul puts the batch dim on lanes.
        "w3t": jnp.pad(params["w3"].T, ((0, 0), (0, ph))).astype(compute_dtype),
        "b3": params["b3"].reshape(1, 1).astype(jnp.float32),
    }


def value_network_forward(state, packed, *, block_b=512):
    """state: (B, state_dim) float32. Returns (B, 1) float32."""
    b, s = state.shape
    h_pad = packed["w2"].shape[0]
    assert packed["w1"].shape == (s, h_pad), "packed params do not match state_dim"
    itemsize = packed["w1"].dtype.itemsize

    tb, n_blocks = _pick_tiling(b, s, h_pad, block_b, itemsize)
    b_pad = tb * n_blocks
    # Only the last-tile batch remainder is ever padded; the feature dim is
    # streamed at its natural width (full-dim block) and cast in-kernel.
    x = state if b_pad == b else jnp.pad(state, ((0, b_pad - b), (0, 0)))

    flops = 2 * b_pad * (s * h_pad + h_pad * h_pad + h_pad)
    bytes_accessed = (b_pad * s * 4 + b_pad * 4
                      + (s * h_pad + h_pad * h_pad + h_pad) * itemsize
                      + (2 * h_pad + 1) * 4)
    vmem_limit = int(min(64 * 1024 * 1024,
                         max(16 * 1024 * 1024,
                             1.5 * _vmem_estimate(tb, s, h_pad, itemsize))))

    # TODO(synk): pipeline_mode=pl.Buffered(1) on the constant weight blocks
    # would halve their VMEM footprint (matters for very large H on v7x);
    # omitted here pending confirmation it is honored by the TPU pallas_call
    # pipeline — the VMEM budget above accounts for the 2x instead.
    out = pl.pallas_call(
        _value_mlp_kernel,
        out_shape=jax.ShapeDtypeStruct((1, b_pad), jnp.float32),
        grid=(n_blocks,),
        in_specs=[
            pl.BlockSpec((tb, s), lambda i: (i, 0)),           # streamed batch tile
            pl.BlockSpec((s, h_pad), lambda i: (0, 0)),        # resident weights
            pl.BlockSpec((1, h_pad), lambda i: (0, 0)),
            pl.BlockSpec((h_pad, h_pad), lambda i: (0, 0)),
            pl.BlockSpec((1, h_pad), lambda i: (0, 0)),
            pl.BlockSpec((1, h_pad), lambda i: (0, 0)),
            pl.BlockSpec(memory_space=pltpu.MemorySpace.SMEM),  # b3 scalar
        ],
        out_specs=pl.BlockSpec((1, tb), lambda i: (0, i)),     # batch on lanes
        compiler_params=pltpu.CompilerParams(
            dimension_semantics=("parallel",),                  # megacore on v7x
            vmem_limit_bytes=vmem_limit),
        cost_estimate=pl.CostEstimate(
            flops=flops, transcendentals=0, bytes_accessed=bytes_accessed),
    )(x, packed["w1"], packed["b1"], packed["w2"], packed["b2"],
      packed["w3t"], packed["b3"])

    # TODO(synk): for tiny batches (B < ~128) a plain XLA jnp expression beats
    # the pallas_call launch overhead; call-site policy left to the user.
    return out[0, :b, None]


def init_value_network_params(key, state_dim, hidden_dim):
    """Deterministic params mirroring weights_init_value_fn:
    xavier_uniform_(weight, gain=1), bias = 0."""
    def xavier_uniform(k, fan_in, fan_out):
        bound = jnp.sqrt(6.0 / (fan_in + fan_out))
        # stored as (in, out) so the kernel can do x @ W directly
        return jax.random.uniform(k, (fan_in, fan_out), jnp.float32,
                                  minval=-bound, maxval=bound)

    k1, k2, k3 = jax.random.split(key, 3)
    return {
        "w1": xavier_uniform(k1, state_dim, hidden_dim),
        "b1": jnp.zeros((1, hidden_dim), jnp.float32),
        "w2": xavier_uniform(k2, hidden_dim, hidden_dim),
        "b2": jnp.zeros((1, hidden_dim), jnp.float32),
        "w3": xavier_uniform(k3, hidden_dim, 1),
        "b3": jnp.zeros((1, 1), jnp.float32),
    }


if __name__ == "__main__":
    key = jax.random.PRNGKey(0)
    k_state, k_params = jax.random.split(key)

    batch, state_dim, hidden_dim = 8, 16, 32
    state = jax.random.normal(k_state, (batch, state_dim), jnp.float32)
    params = init_value_network_params(k_params, state_dim, hidden_dim)
    packed = pack_value_network_params(params)      # one-time pad/cast

    fwd = jax.jit(value_network_forward)
    out = jax.block_until_ready(fwd(state, packed))
    assert out.shape == (batch, 1)
    assert bool(jnp.all(jnp.isfinite(out)))

    # Reference 1: identical bf16-operand / f32-accumulate math in plain JAX.
    bf = jnp.bfloat16
    h = jnp.maximum(jnp.dot(state.astype(bf), params["w1"].astype(bf),
                            preferred_element_type=jnp.float32) + params["b1"], 0.0)
    h = jnp.maximum(jnp.dot(h.astype(bf), params["w2"].astype(bf),
                            preferred_element_type=jnp.float32) + params["b2"], 0.0)
    ref_bf16 = jnp.dot(h.astype(bf), params["w3"].astype(bf),
                       preferred_element_type=jnp.float32) + params["b3"]
    assert jnp.allclose(out, ref_bf16, atol=1e-4, rtol=1e-4)

    # Reference 2: full-f32 PyTorch-equivalent math (loose tol for bf16 operands).
    h = jnp.maximum(state @ params["w1"] + params["b1"], 0.0)
    h = jnp.maximum(h @ params["w2"] + params["b2"], 0.0)
    ref_f32 = h @ params["w3"] + params["b3"]
    assert jnp.allclose(out, ref_f32, atol=5e-2, rtol=5e-2)

    print("KERNEL_OK")
</pallas_src>

<mosaic_0001>
module attributes {stable_mosaic.version = 11 : i64} {
  func.func @_value_mlp_kernel(%arg0: i32, %arg1: memref<128x16xf32, #tpu.memory_space<vmem>>, %arg2: memref<16x128xbf16, #tpu.memory_space<vmem>>, %arg3: memref<1x128xf32, #tpu.memory_space<vmem>>, %arg4: memref<128x128xbf16, #tpu.memory_space<vmem>>, %arg5: memref<1x128xf32, #tpu.memory_space<vmem>>, %arg6: memref<1x128xbf16, #tpu.memory_space<vmem>>, %arg7: memref<1x1xf32, #tpu.memory_space<smem>>, %arg8: memref<1x128xf32, #tpu.memory_space<vmem>>) attributes {dimension_semantics = [#tpu.dimension_semantics<parallel>], iteration_bounds = array<i64: 1>, scalar_prefetch = 0 : i64, scratch_operands = 0 : i64, tpu.core_type = #tpu.core_type<tc>, window_params = [{transform_indices = @transform_0, window_bounds = array<i64: 128, 16>}, {pipeline_mode = #tpu.pipeline_mode<synchronous>, transform_indices = @transform_1, window_bounds = array<i64: 16, 128>}, {pipeline_mode = #tpu.pipeline_mode<synchronous>, transform_indices = @transform_2, window_bounds = array<i64: 1, 128>}, {pipeline_mode = #tpu.pipeline_mode<synchronous>, transform_indices = @transform_3, window_bounds = array<i64: 128, 128>}, {pipeline_mode = #tpu.pipeline_mode<synchronous>, transform_indices = @transform_4, window_bounds = array<i64: 1, 128>}, {pipeline_mode = #tpu.pipeline_mode<synchronous>, transform_indices = @transform_5, window_bounds = array<i64: 1, 128>}, {transform_indices = @transform_6, window_bounds = array<i64: 1, 1>}, {transform_indices = @transform_7, window_bounds = array<i64: 1, 128>}]} {
    %c0 = arith.constant 0 : index
    %c0_0 = arith.constant 0 : index
    %0 = vector.load %arg1[%c0, %c0_0] : memref<128x16xf32, #tpu.memory_space<vmem>>, vector<128x16xf32>
    %1 = arith.truncf %0 : vector<128x16xf32> to vector<128x16xbf16>
    %c0_1 = arith.constant 0 : index
    %c0_2 = arith.constant 0 : index
    %2 = vector.load %arg2[%c0_1, %c0_2] : memref<16x128xbf16, #tpu.memory_space<vmem>>, vector<16x128xbf16>
    %cst = arith.constant dense<0.000000e+00> : vector<128x128xf32>
    %3 = tpu.matmul %1, %2, %cst {dimension_numbers = #tpu.dot_dimension_numbers<[1], [0], [0], [1], [0, 0, 1, 1], [], []>} : vector<128x16xbf16>, vector<16x128xbf16>, vector<128x128xf32> -> vector<128x128xf32>
    %c0_3 = arith.constant 0 : index
    %c0_4 = arith.constant 0 : index
    %4 = vector.load %arg3[%c0_3, %c0_4] : memref<1x128xf32, #tpu.memory_space<vmem>>, vector<1x128xf32>
    %5 = vector.broadcast %4 : vector<1x128xf32> to vector<128x128xf32>
    %6 = arith.addf %3, %5 : vector<128x128xf32>
    %cst_5 = arith.constant 0.000000e+00 : f32
    %7 = vector.broadcast %cst_5 : f32 to vector<128x128xf32>
    %8 = arith.maximumf %6, %7 : vector<128x128xf32>
    %9 = arith.truncf %8 : vector<128x128xf32> to vector<128x128xbf16>
    %c0_6 = arith.constant 0 : index
    %c0_7 = arith.constant 0 : index
    %10 = vector.load %arg4[%c0_6, %c0_7] : memref<128x128xbf16, #tpu.memory_space<vmem>>, vector<128x128xbf16>
    %cst_8 = arith.constant dense<0.000000e+00> : vector<128x128xf32>
    %11 = tpu.matmul %9, %10, %cst_8 {dimension_numbers = #tpu.dot_dimension_numbers<[1], [0], [0], [1], [0, 0, 1, 1], [], []>} : vector<128x128xbf16>, vector<128x128xbf16>, vector<128x128xf32> -> vector<128x128xf32>
    %c0_9 = arith.constant 0 : index
    %c0_10 = arith.constant 0 : index
    %12 = vector.load %arg5[%c0_9, %c0_10] : memref<1x128xf32, #tpu.memory_space<vmem>>, vector<1x128xf32>
    %13 = vector.broadcast %12 : vector<1x128xf32> to vector<128x128xf32>
    %14 = arith.addf %11, %13 : vector<128x128xf32>
    %cst_11 = arith.constant 0.000000e+00 : f32
    %15 = vector.broadcast %cst_11 : f32 to vector<128x128xf32>
    %16 = arith.maximumf %14, %15 : vector<128x128xf32>
    %c0_12 = arith.constant 0 : index
    %c0_13 = arith.constant 0 : index
    %17 = vector.load %arg6[%c0_12, %c0_13] : memref<1x128xbf16, #tpu.memory_space<vmem>>, vector<1x128xbf16>
    %18 = arith.truncf %16 : vector<128x128xf32> to vector<128x128xbf16>
    %cst_14 = arith.constant dense<0.000000e+00> : vector<1x128xf32>
    %19 = tpu.matmul %17, %18, %cst_14 {dimension_numbers = #tpu.dot_dimension_numbers<[1], [1], [0], [0], [0, 0, 1, 0], [], []>} : vector<1x128xbf16>, vector<128x128xbf16>, vector<1x128xf32> -> vector<1x128xf32>
    %c0_15 = arith.constant 0 : index
    %c0_16 = arith.constant 0 : index
    %20 = memref.load %arg7[%c0_15, %c0_16] : memref<1x1xf32, #tpu.memory_space<smem>>
    %21 = vector.broadcast %20 : f32 to vector<1x128xf32>
    %22 = arith.addf %19, %21 : vector<1x128xf32>
    %c0_17 = arith.constant 0 : index
    %c0_18 = arith.constant 0 : index
    %23 = vector.load %arg8[%c0_17, %c0_18] : memref<1x128xf32, #tpu.memory_space<vmem>>, vector<1x128xf32>
    tpu.vector_store %arg8[%c0_17, %c0_18], %22 {strides = array<i32>} : memref<1x128xf32, #tpu.memory_space<vmem>>, vector<1x128xf32>,
    return
  }
  func.func @transform_0(%arg0: i32) -> (i32, i32) {
    %c0_i32 = arith.constant 0 : i32
    %c0_i32_0 = arith.constant 0 : i32
    return %arg0, %c0_i32 : i32, i32
  }
  func.func @transform_1(%arg0: i32) -> (i32, i32) {
    %c0_i32 = arith.constant 0 : i32
    %c0_i32_0 = arith.constant 0 : i32
    %c0_i32_1 = arith.constant 0 : i32
    return %c0_i32, %c0_i32_0 : i32, i32
  }
  func.func @transform_2(%arg0: i32) -> (i32, i32) {
    %c0_i32 = arith.constant 0 : i32
    %c0_i32_0 = arith.constant 0 : i32
    %c0_i32_1 = arith.constant 0 : i32
    return %c0_i32, %c0_i32_0 : i32, i32
  }
  func.func @transform_3(%arg0: i32) -> (i32, i32) {
    %c0_i32 = arith.constant 0 : i32
    %c0_i32_0 = arith.constant 0 : i32
    %c0_i32_1 = arith.constant 0 : i32
    return %c0_i32, %c0_i32_0 : i32, i32
  }
  func.func @transform_4(%arg0: i32) -> (i32, i32) {
    %c0_i32 = arith.constant 0 : i32
    %c0_i32_0 = arith.constant 0 : i32
    %c0_i32_1 = arith.constant 0 : i32
    return %c0_i32, %c0_i32_0 : i32, i32
  }
  func.func @transform_5(%arg0: i32) -> (i32, i32) {
    %c0_i32 = arith.constant 0 : i32
    %c0_i32_0 = arith.constant 0 : i32
    %c0_i32_1 = arith.constant 0 : i32
    return %c0_i32, %c0_i32_0 : i32, i32
  }
  func.func @transform_6(%arg0: i32) -> (i32, i32) {
    %c0_i32 = arith.constant 0 : i32
    %c0_i32_0 = arith.constant 0 : i32
    %c0_i32_1 = arith.constant 0 : i32
    return %c0_i32, %c0_i32_0 : i32, i32
  }
  func.func @transform_7(%arg0: i32) -> (i32, i32) {
    %c0_i32 = arith.constant 0 : i32
    %c0_i32_0 = arith.constant 0 : i32
    return %c0_i32, %arg0 : i32, i32
  }
}

</mosaic_0001>

<bundles_post_ra>
// kernel: value_network_forward.1
= control target key start
LH: loop header
LB: loop body
LE: loop exit
PB: predicated region body
PF: predicated region fallthrough
CT: control target
= control target key end

     0   :  { %vm64_vm0 = vcmask 130048   ;;  %s525_s1 = inlined_call_operand.vmem [shape: bf16[16,128], index: 1, kind: input, shape index: {}]   ;;  %s526_s0 = inlined_call_operand.vmem [shape: f32[128,16], index: 0, kind: input, shape index: {}]   ;;  %s527_s2 = inlined_call_operand.vmem [shape: f32[1,128], index: 2, kind: input, shape index: {}]   ;;  %s528_s3 = inlined_call_operand.vmem [shape: bf16[128,128], index: 3, kind: input, shape index: {}]   ;;  %s529_s4 = inlined_call_operand.vmem [shape: f32[1,128], index: 4, kind: input, shape index: {}]   ;;  %s530_s5 = inlined_call_operand.vmem [shape: bf16[1,128], index: 5, kind: input, shape index: {}]   ;;  %s531_s6 = inlined_call_operand.<no memory space> [shape: f32[1,1], index: 6, kind: input, shape index: {}]   ;;  %s532_s7 = inlined_call_operand.vmem [shape: f32[1,128], index: 7, kind: output, shape index: {}]  }
   0x1   :  { %v368_v0 = vld [vmem:[%s525_s1] sm:$0xff]  ;;  %v29_v2 = vld [vmem:[%s526_s0 + $0x8] sm:$0xff]  ;;  %v30_v4 = vld [vmem:[%s526_s0 + $0x10] sm:$0xff] }
   0x2   :  { %v28_v1 = vld [vmem:[%s526_s0] sm:$0xff]  ;;  %96 = vmatpush.bf16.msra.mxu0 %v368_v0  ;;  %v31_v5 = vld [vmem:[%s526_s0 + $0x18] sm:$0xff]  ;;  %v33_v8 = vld [vmem:[%s526_s0 + $0x28] sm:$0xff] }
   0x3   :  { %v44_v3 = vpack.c.bf16 %v29_v2, %v28_v1  ;;  %v45_v6 = vpack.c.bf16 %v31_v5, %v30_v4  ;;  %v32_v7 = vld [vmem:[%s526_s0 + $0x20] sm:$0xff]  ;;  %v34_v10 = vld [vmem:[%s526_s0 + $0x30] sm:$0xff]  ;;  %v35_v11 = vld [vmem:[%s526_s0 + $0x38] sm:$0xff] }
   0x4   :  { %v46_v9 = vpack.c.bf16 %v33_v8, %v32_v7  ;;  %v47_v12 = vpack.c.bf16 %v35_v11, %v34_v10  ;;  %v36_v13 = vld [vmem:[%s526_s0 + $0x40] sm:$0xff]  ;;  %v37_v14 = vld [vmem:[%s526_s0 + $0x48] sm:$0xff]  ;;  %v376_v16 = vld [vmem:[%s528_s3 + $0x38] sm:$0xff] }
   0x5   :  { %328 = vmatmul.msk.bf16.vlgmr.msra.gmra.mxu0 %vm64_vm0, %v44_v3  ;;  %v48_v15 = vpack.c.bf16 %v37_v14, %v36_v13  ;;  %230 = vmatpush.bf16.msra.mxu1 %v376_v16  ;;  %v38_v17 = vld [vmem:[%s526_s0 + $0x50] sm:$0xff]  ;;  %v39_v18 = vld [vmem:[%s526_s0 + $0x58] sm:$0xff]  ;;  %v374_v21 = vld [vmem:[%s528_s3 + $0x28] sm:$0xff] }
   0x6   :  { %377 = vmatpush.bf16.msra.mxu3 %v376_v16  ;;  %v49_v19 = vpack.c.bf16 %v39_v18, %v38_v17  ;;  %v375_v20 = vld [vmem:[%s528_s3 + $0x30] sm:$0xff]  ;;  %v373_v22 = vld [vmem:[%s528_s3 + $0x20] sm:$0xff]  ;;  %v41_v24 = vld [vmem:[%s526_s0 + $0x68] sm:$0xff] }
   0x7   :  { %v40_v23 = vld [vmem:[%s526_s0 + $0x60] sm:$0xff]  ;;  %v372_v25 = vld [vmem:[%s528_s3 + $0x18] sm:$0xff]  ;;  %v371_v27 = vld [vmem:[%s528_s3 + $0x10] sm:$0xff] }
   0x8   :  { %v50_v26 = vpack.c.bf16 %v41_v24, %v40_v23  ;;  %v370_v28 = vld [vmem:[%s528_s3 + $0x8] sm:$0xff]  ;;  %v369_v29 = vld [vmem:[%s528_s3] sm:$0xff]  ;;  %v42_v30 = vld [vmem:[%s526_s0 + $0x70] sm:$0xff] }
   0x9   :  { %231 = vmatpush.bf16.msra.mxu1 %v375_v20  ;;  %v43_v31 = vld [vmem:[%s526_s0 + $0x78] sm:$0xff]  ;;  %v385_v34 = vld [vmem:[%s527_s2] ss:$0 sm:$0xff] }
   0xa   :  { %378 = vmatpush.bf16.msra.mxu3 %v375_v20  ;;  %v51_v32 = vpack.c.bf16 %v43_v31, %v42_v30 }
   0xd   :  { %232 = vmatpush.bf16.msra.mxu1 %v374_v21 }
   0xe   :  { %379 = vmatpush.bf16.msra.mxu3 %v374_v21 }
  0x11   :  { %233 = vmatpush.bf16.msra.mxu1 %v373_v22 }
  0x12   :  { %380 = vmatpush.bf16.msra.mxu3 %v373_v22 }
  0x15   :  { %329 = vmatmul.msk.bf16.gmra.mxu0 %vm64_vm0, %v45_v6  ;;  %234 = vmatpush.bf16.msra.mxu1 %v372_v25 }
  0x16   :  { %381 = vmatpush.bf16.msra.mxu3 %v372_v25 }
  0x19   :  { %235 = vmatpush.bf16.msra.mxu1 %v371_v27 }
  0x1a   :  { %382 = vmatpush.bf16.msra.mxu3 %v371_v27  ;;  %v386_v27 = vld [vmem:[%s529_s4] ss:$0 sm:$0xff] }
  0x1d   :  { %236 = vmatpush.bf16.msra.mxu1 %v370_v28 }
  0x1e   :  { %383 = vmatpush.bf16.msra.mxu3 %v370_v28 }
  0x21   :  { %237 = vmatpush.bf16.msra.mxu1 %v369_v29 }
  0x22   :  { %384 = vmatpush.bf16.msra.mxu3 %v369_v29 }
  0x25   :  { %330 = vmatmul.msk.bf16.gmra.mxu0 %vm64_vm0, %v46_v9 }
  0x35   :  { %331 = vmatmul.msk.bf16.gmra.mxu0 %vm64_vm0, %v47_v12 }
  0x45   :  { %332 = vmatmul.msk.bf16.gmra.mxu0 %vm64_vm0, %v48_v15 }
  0x55   :  { %333 = vmatmul.msk.bf16.gmra.mxu0 %vm64_vm0, %v49_v19 }
  0x65   :  { %334 = vmatmul.msk.bf16.gmra.mxu0 %vm64_vm0, %v50_v26 }
  0x75   :  { %335 = vmatmul.msk.bf16.gmra.mxu0 %vm64_vm0, %v51_v32 }
  0x82   :  { %v98_v33 = vpop.f32.mrf.mxu0 }
  0x83   :  { %v99_v35 = vadd.f32 %v385_v34, %v98_v33 }
  0x85   :  { %v138_v38 = vmax.f32 %v99_v35, 0.0 }
  0x8a   :  { %v100_v36 = vpop.f32.mrf.mxu0 }
  0x8b   :  { %v101_v37 = vadd.f32 %v385_v34, %v100_v36 }
  0x8d   :  { %v139_v39 = vmax.f32 %v101_v37, 0.0 }
  0x8f   :  { %v154_v40 = vpack.c.bf16 %v139_v39, %v138_v38 }
  0x91   :  { %238 = vmatmul.bf16.vlgmr.msra.gmra.mxu1 %v154_v40 }
  0x92   :  { %v103_v41 = vpop.f32.mrf.mxu0 }
  0x93   :  { %v104_v42 = vadd.f32 %v385_v34, %v103_v41 }
  0x95   :  { %v140_v45 = vmax.f32 %v104_v42, 0.0 }
  0x9a   :  { %v105_v43 = vpop.f32.mrf.mxu0 }
  0x9b   :  { %v106_v44 = vadd.f32 %v385_v34, %v105_v43 }
  0x9d   :  { %v141_v46 = vmax.f32 %v106_v44, 0.0 }
  0x9f   :  { %v155_v47 = vpack.c.bf16 %v141_v46, %v140_v45 }
  0xa1   :  { %243 = vmatmul.bf16.gmra.mxu1 %v155_v47 }
  0xa2   :  { %v108_v48 = vpop.f32.mrf.mxu0 }
  0xa3   :  { %v109_v49 = vadd.f32 %v385_v34, %v108_v48 }
  0xa5   :  { %v142_v52 = vmax.f32 %v109_v49, 0.0 }
  0xaa   :  { %v110_v50 = vpop.f32.mrf.mxu0 }
  0xab   :  { %v111_v51 = vadd.f32 %v385_v34, %v110_v50 }
  0xad   :  { %v143_v53 = vmax.f32 %v111_v51, 0.0 }
  0xaf   :  { %v156_v54 = vpack.c.bf16 %v143_v53, %v142_v52 }
  0xb1   :  { %248 = vmatmul.bf16.gmra.mxu1 %v156_v54 }
  0xb2   :  { %v113_v55 = vpop.f32.mrf.mxu0 }
  0xb3   :  { %v114_v56 = vadd.f32 %v385_v34, %v113_v55 }
  0xb5   :  { %v144_v59 = vmax.f32 %v114_v56, 0.0 }
  0xba   :  { %v115_v57 = vpop.f32.mrf.mxu0 }
  0xbb   :  { %v116_v58 = vadd.f32 %v385_v34, %v115_v57 }
  0xbd   :  { %v145_v60 = vmax.f32 %v116_v58, 0.0 }
  0xbf   :  { %v157_v61 = vpack.c.bf16 %v145_v60, %v144_v59 }
  0xc1   :  { %253 = vmatmul.bf16.gmra.mxu1 %v157_v61 }
  0xc2   :  { %v118_v62 = vpop.f32.mrf.mxu0 }
  0xc3   :  { %v119_v63 = vadd.f32 %v385_v34, %v118_v62 }
  0xc5   :  { %v146_v2 = vmax.f32 %v119_v63, 0.0 }
  0xca   :  { %v120_v0 = vpop.f32.mrf.mxu0 }
  0xcb   :  { %v121_v1 = vadd.f32 %v385_v34, %v120_v0 }
  0xcd   :  { %v147_v3 = vmax.f32 %v121_v1, 0.0 }
  0xcf   :  { %v158_v4 = vpack.c.bf16 %v147_v3, %v146_v2 }
  0xd1   :  { %258 = vmatmul.bf16.gmra.mxu1 %v158_v4 }
  0xd2   :  { %v123_v5 = vpop.f32.mrf.mxu0 }
  0xd3   :  { %v124_v6 = vadd.f32 %v385_v34, %v123_v5 }
  0xd5   :  { %v148_v9 = vmax.f32 %v124_v6, 0.0 }
  0xda   :  { %v125_v7 = vpop.f32.mrf.mxu0 }
  0xdb   :  { %v126_v8 = vadd.f32 %v385_v34, %v125_v7 }
  0xdd   :  { %v149_v10 = vmax.f32 %v126_v8, 0.0 }
  0xdf   :  { %v159_v11 = vpack.c.bf16 %v149_v10, %v148_v9 }
  0xe1   :  { %263 = vmatmul.bf16.vlgmr.msra.gmra.mxu3 %v159_v11 }
  0xe2   :  { %v128_v12 = vpop.f32.mrf.mxu0 }
  0xe3   :  { %v129_v13 = vadd.f32 %v385_v34, %v128_v12 }
  0xe5   :  { %v150_v16 = vmax.f32 %v129_v13, 0.0 }
  0xea   :  { %v130_v14 = vpop.f32.mrf.mxu0 }
  0xeb   :  { %v131_v15 = vadd.f32 %v385_v34, %v130_v14 }
  0xed   :  { %v151_v17 = vmax.f32 %v131_v15, 0.0 }
  0xef   :  { %v160_v18 = vpack.c.bf16 %v151_v17, %v150_v16 }
  0xf1   :  { %268 = vmatmul.bf16.gmra.mxu3 %v160_v18 }
  0xf2   :  { %v133_v19 = vpop.f32.mrf.mxu0 }
  0xf3   :  { %v134_v20 = vadd.f32 %v385_v34, %v133_v19  ;;  %v295_v19 = vld [vmem:[%s530_s5] sm:$0x1] }
  0xf5   :  { %v152_v23 = vmax.f32 %v134_v20, 0.0  ;;  %v305_v20 = vstv %s531_s6 }
  0xfa   :  { %v135_v21 = vpop.f32.mrf.mxu0 }
  0xfb   :  { %v136_v22 = vadd.f32 %v385_v34, %v135_v21 }
  0xfd   :  { %v153_v24 = vmax.f32 %v136_v22, 0.0 }
  0xff   :  { %v161_v25 = vpack.c.bf16 %v153_v24, %v152_v23 }
 0x101   :  { %273 = vmatmul.bf16.gmra.mxu3 %v161_v25 }
 0x10e   :  { %v239_v26 = vpop.f32.mrf.mxu1 }
 0x10f   :  { %v240_v28 = vadd.f32 %v386_v27, %v239_v26 }
 0x111   :  { %v279_v31 = vmax.f32 %v240_v28, 0.0 }
 0x116   :  { %v241_v29 = vpop.f32.mrf.mxu1 }
 0x117   :  { %v242_v30 = vadd.f32 %v386_v27, %v241_v29 }
 0x119   :  { %v280_v32 = vmax.f32 %v242_v30, 0.0 }
 0x11b   :  { %v296_v33 = vpack.c.bf16 %v280_v32, %v279_v31 }
 0x11e   :  { %v244_v35 = vpop.f32.mrf.mxu1 }
 0x11f   :  { %v245_v36 = vadd.f32 %v386_v27, %v244_v35 }
 0x121   :  { %v281_v34 = vmax.f32 %v245_v36, 0.0 }
 0x126   :  { %v246_v37 = vpop.f32.mrf.mxu1 }
 0x127   :  { %v247_v38 = vadd.f32 %v386_v27, %v246_v37 }
 0x129   :  { %v282_v39 = vmax.f32 %v247_v38, 0.0 }
 0x12b   :  { %v297_v40 = vpack.c.bf16 %v282_v39, %v281_v34 }
 0x12e   :  { %v249_v42 = vpop.f32.mrf.mxu1 }
 0x12f   :  { %v250_v15 = vadd.f32 %v386_v27, %v249_v42 }
 0x131   :  { %v283_v17 = vmax.f32 %v250_v15, 0.0 }
 0x136   :  { %v251_v45 = vpop.f32.mrf.mxu1 }
 0x137   :  { %v252_v13 = vadd.f32 %v386_v27, %v251_v45 }
 0x139   :  { %v284_v16 = vmax.f32 %v252_v13, 0.0 }
 0x13b   :  { %v298_v18 = vpack.c.bf16 %v284_v16, %v283_v17 }
 0x13e   :  { %v254_v47 = vpop.f32.mrf.mxu1 }
 0x13f   :  { %v255_v10 = vadd.f32 %v386_v27, %v254_v47 }
 0x141   :  { %v285_v12 = vmax.f32 %v255_v10, 0.0 }
 0x146   :  { %v256_v49 = vpop.f32.mrf.mxu1 }
 0x147   :  { %v257_v8 = vadd.f32 %v386_v27, %v256_v49 }
 0x149   :  { %v286_v11 = vmax.f32 %v257_v8, 0.0 }
 0x14b   :  { %v299_v14 = vpack.c.bf16 %v286_v11, %v285_v12 }
 0x14e   :  { %v259_v58 = vpop.f32.mrf.mxu1 }
 0x14f   :  { %v260_v5 = vadd.f32 %v386_v27, %v259_v58 }
 0x151   :  { %v287_v7 = vmax.f32 %v260_v5, 0.0 }
 0x156   :  { %v261_v1 = vpop.f32.mrf.mxu1 }
 0x157   :  { %v262_v3 = vadd.f32 %v386_v27, %v261_v1 }
 0x159   :  { %v288_v6 = vmax.f32 %v262_v3, 0.0 }
 0x15b   :  { %v300_v9 = vpack.c.bf16 %v288_v6, %v287_v7 }
 0x164   :  { %v264_v41 = vpop.f32.mrf.mxu3 }
 0x165   :  { %v265_v63 = vadd.f32 %v386_v27, %v264_v41 }
 0x167   :  { %v289_v2 = vmax.f32 %v265_v63, 0.0 }
 0x16c   :  { %v266_v43 = vpop.f32.mrf.mxu3 }
 0x16d   :  { %v267_v61 = vadd.f32 %v386_v27, %v266_v43 }
 0x16f   :  { %v290_v0 = vmax.f32 %v267_v61, 0.0 }
 0x171   :  { %v301_v4 = vpack.c.bf16 %v290_v0, %v289_v2 }
 0x174   :  { %v269_v44 = vpop.f32.mrf.mxu3 }
 0x175   :  { %v270_v57 = vadd.f32 %v386_v27, %v269_v44 }
 0x177   :  { %v291_v60 = vmax.f32 %v270_v57, 0.0 }
 0x17c   :  { %v271_v46 = vpop.f32.mrf.mxu3 }
 0x17d   :  { %v272_v55 = vadd.f32 %v386_v27, %v271_v46 }
 0x17f   :  { %v292_v59 = vmax.f32 %v272_v55, 0.0 }
 0x181   :  { %v302_v62 = vpack.c.bf16 %v292_v59, %v291_v60 }
 0x184   :  { %v274_v48 = vpop.f32.mrf.mxu3 }
 0x185   :  { %v275_v50 = vadd.f32 %v386_v27, %v274_v48 }
 0x187   :  { %v293_v53 = vmax.f32 %v275_v50, 0.0 }
 0x18c   :  { %v276_v51 = vpop.f32.mrf.mxu3 }
 0x18d   :  { %v277_v52 = vadd.f32 %v386_v27, %v276_v51 }
 0x18f   :  { %v294_v54 = vmax.f32 %v277_v52, 0.0 }
 0x191   :  { %v303_v56 = vpack.c.bf16 %v294_v54, %v293_v53 }
 0x193   :  { %306 = vmatpush.bf16.xpose.msra.mxu2 %v303_v56 }
 0x19b   :  { %307 = vmatpush.bf16.xpose.msra.mxu2 %v302_v62 }
 0x1a3   :  { %308 = vmatpush.bf16.xpose.msra.mxu2 %v301_v4 }
 0x1ab   :  { %309 = vmatpush.bf16.xpose.msra.mxu2 %v300_v9 }
 0x1b3   :  { %310 = vmatpush.bf16.xpose.msra.mxu2 %v299_v14 }
 0x1bb   :  { %311 = vmatpush.bf16.xpose.msra.mxu2 %v298_v18 }
 0x1c3   :  { %312 = vmatpush.bf16.xpose.msra.mxu2 %v297_v40 }
 0x1cb   :  { %313 = vmatpush.bf16.xpose.msra.mxu2 %v296_v33 }
 0x1d2   :  { %314 = vmatmul.bf16.vlgmr.msra.gmra.mxu2 %v295_v19 }
 0x255   :  { %v315_v21 = vpop.f32.mrf.mxu2 }
 0x256   :  { %v316_v22 = vadd.f32 %v315_v21, %v305_v20 }
 0x258   :  { %319 = vst [vmem:[%s532_s7] sm:$0x1] %v316_v22 }
 0x25d   :  { %v317_v23 = vpop.f32.mrf.mxu2 }

</bundles_post_ra>
